<compile_context>
chip_gen: v7x
topology: tpu7x:2x2x1
jax: 0.10.0
libtpu: 0.0.40
codegen_flags: <defaults>
</compile_context>

<pallas_src>
import math

import jax
import jax.numpy as jnp
from jax import lax
from jax.experimental import pallas as pl
from jax.experimental.pallas import tpu as pltpu


def _downsample_kernel(x_ref, w_ref, b_ref, o_ref, col_ref):
    # x_ref  : (6, th, We, Cin)   plane 2*kh+p:  x_ref[2*kh+p, i, cw, ci] = pad[2*i+kh, 2*cw+p, ci]
    # w_ref  : (9*Cin, Ct)        tap-major weight slab, tap t = 3*kh + kw
    # b_ref  : (1, Ct)            f32 bias
    # o_ref  : (th*Wo, Ct)        output slab for this (batch, h-tile, cout-tile) grid step
    # col_ref: (th*Wo, 9*Cin)     VMEM scratch: im2col slab (compute dtype)
    _, th, we, cin = x_ref.shape
    wo = we - 1

    # Build the im2col slab: 9 static contiguous slices -> contiguous column blocks.
    for kh in range(3):
        for kw in range(3):
            t = 3 * kh + kw
            plane = 2 * kh + (kw % 2)
            ow = kw // 2
            patch = x_ref[plane, :, ow:ow + wo, :]              # (th, wo, cin)
            col_ref[:, t * cin:(t + 1) * cin] = patch.reshape(th * wo, cin)

    # Single long-K MXU matmul (K = 9*Cin) + bias; accumulate in f32.
    acc = jnp.dot(col_ref[...], w_ref[...], preferred_element_type=jnp.float32)
    o_ref[...] = (acc + b_ref[...]).astype(o_ref.dtype)


def _pick_h_tile(ho, wo, we, c, tc, in_item, out_item, budget_bytes):
    """Largest divisor of Ho that keeps >=2 h-tiles (when possible), legal block shapes,
    and the estimated double-buffered VMEM residency under budget."""
    def est(th):
        x_blk = 6 * th * we * c * in_item          # activation block
        w_blk = 9 * c * tc * in_item               # weight block
        o_blk = th * wo * tc * out_item            # output block
        col = th * wo * 9 * c * in_item            # im2col scratch (single-buffered)
        acc = th * wo * tc * 4                     # f32 matmul epilogue value
        return 2 * (x_blk + w_blk + o_blk) + col + acc

    divisors = [d for d in range(ho, 0, -1) if ho % d == 0]
    legal = [d for d in divisors if (d * wo) % 8 == 0 or d == ho]   # (8,128) store rule
    pref = [d for d in legal if ho // d >= 2] or legal              # >=2 h-tiles (v7x megacore)
    fit = [d for d in pref if est(d) <= budget_bytes]
    th = max(fit) if fit else min(pref)
    return th, est(th)


def downsample(x_nchw, w_oihw, b, *, compute_dtype=None):
    """Conv2d(C, C, k=3, s=2, p=1) forward.  x_nchw: (N, C, H, W) -> (N, C, Ho, Wo).

    compute_dtype=jnp.bfloat16 enables the bf16 MXU path (valid on v5e/v6e/v7x);
    accumulation and bias-add stay in f32.
    """
    N, C, H, W = x_nchw.shape
    Ho = (H + 2 - 3) // 2 + 1
    Wo = (W + 2 - 3) // 2 + 1
    He, We = Ho + 1, Wo + 1

    if compute_dtype is None:
        compute_dtype = x_nchw.dtype
    in_item = jnp.dtype(compute_dtype).itemsize
    out_item = jnp.dtype(x_nchw.dtype).itemsize

    # ---- lane-dense output channels: pad Cout to a multiple of 128 ------------------
    Cp = ((C + 127) // 128) * 128

    # ---- generation-aware Cout tile --------------------------------------------------
    try:
        kind = jax.devices()[0].device_kind.lower()
    except Exception:  # pragma: no cover
        kind = ""
    pref_tc = 256 if ("v6" in kind or "v7" in kind) else 128   # 2x256x256 MXU vs 4x128x128
    tc = pref_tc if Cp % pref_tc == 0 else 128
    n_ct = Cp // tc

    # ---- H tile: bound VMEM, keep >=2 h-tiles for v7x megacore ----------------------
    th, est_bytes = _pick_h_tile(Ho, Wo, We, C, tc, in_item, out_item, 20 * 2**20)
    n_ht = Ho // th
    vmem_limit = int(min(64 * 2**20, max(32 * 2**20, round(1.5 * est_bytes))))

    # ---- one fused wrapper pass: NCHW -> kh-shifted / column-parity planes ----------
    # X[n, 2*kh+p, i, cw, ci] = padded[n, 2*i+kh, 2*cw+p, ci]
    x = jnp.transpose(x_nchw, (0, 2, 3, 1))                                  # NHWC
    x = jnp.pad(x, ((0, 0), (1, 2 * He - (H + 1)), (1, 2 * We - (W + 1)), (0, 0)))
    x = x.astype(compute_dtype)
    xr = x.reshape(N, He, 2, We, 2, C)
    even, odd = xr[:, :, 0], xr[:, :, 1]                                     # (N, He, We, 2, C)
    X = jnp.stack([even[:, :Ho], odd[:, :Ho], even[:, 1:Ho + 1]], axis=1)    # (N, 3, Ho, We, 2, C)
    X = jnp.moveaxis(X, 4, 2).reshape(N, 6, Ho, We, C)                       # (N, 6, Ho, We, C)

    # Tap-major weight slab (9*Cin, Cout) padded to Cp lanes; f32 bias.
    w_slab = jnp.transpose(w_oihw, (2, 3, 1, 0)).reshape(9 * C, C)
    w_slab = jnp.pad(w_slab, ((0, 0), (0, Cp - C))).astype(compute_dtype)
    b2 = jnp.pad(b.astype(jnp.float32), (0, Cp - C)).reshape(1, Cp)

    # ---- shape-dependent grid order --------------------------------------------------
    x_blk = 6 * th * We * C * in_item
    w_blk = 9 * C * tc * in_item
    weight_stationary = w_blk > x_blk          # deep layers: small spatial, large C

    if weight_stationary:
        grid = (n_ct, N, n_ht)
        x_map = lambda c, n, h: (n, 0, h, 0, 0)
        w_map = lambda c, n, h: (0, c)
        b_map = lambda c, n, h: (0, c)
        o_map = lambda c, n, h: (n, h, c)
    else:
        grid = (N, n_ht, n_ct)
        x_map = lambda n, h, c: (n, 0, h, 0, 0)
        w_map = lambda n, h, c: (0, c)
        b_map = lambda n, h, c: (0, c)
        o_map = lambda n, h, c: (n, h, c)

    out = pl.pallas_call(
        _downsample_kernel,
        out_shape=jax.ShapeDtypeStruct((N, Ho * Wo, Cp), x_nchw.dtype),
        grid=grid,
        in_specs=[
            pl.BlockSpec((None, 6, th, We, C), x_map),
            pl.BlockSpec((9 * C, tc), w_map),
            pl.BlockSpec((1, tc), b_map),
        ],
        out_specs=pl.BlockSpec((None, th * Wo, tc), o_map),
        scratch_shapes=[pltpu.VMEM((th * Wo, 9 * C), compute_dtype)],
        compiler_params=pltpu.CompilerParams(
            dimension_semantics=("parallel", "parallel", "parallel"),
            vmem_limit_bytes=vmem_limit,
        ),
    )(X, w_slab, b2)

    out = out[:, :, :C].reshape(N, Ho, Wo, C)
    return jnp.transpose(out, (0, 3, 1, 2))        # back to NCHW


def init_downsample_params(channels, key):
    """Deterministic re-implementation of scaling_init(scale=1, dist='u') + zero bias."""
    fan_in = channels * 3 * 3
    fan_out = channels * 3 * 3
    scale = 1.0 / ((fan_in + fan_out) / 2.0)
    bound = math.sqrt(3.0 * scale)
    w = jax.random.uniform(
        key, (channels, channels, 3, 3), jnp.float32, minval=-bound, maxval=bound
    )  # OIHW, same layout as torch Conv2d.weight
    b = jnp.zeros((channels,), jnp.float32)
    return w, b


if __name__ == "__main__":
    key = jax.random.PRNGKey(0)
    kx, kw_key = jax.random.split(key)

    N, C, H, W = 2, 4, 16, 16
    x = jax.random.normal(kx, (N, C, H, W), jnp.float32)
    w, b = init_downsample_params(C, kw_key)

    # Pure-JAX reference (same semantics as torch Conv2d(C, C, 3, 2, 1)).
    ref = lax.conv_general_dilated(
        x, w, window_strides=(2, 2), padding=((1, 1), (1, 1)),
        dimension_numbers=("NCHW", "OIHW", "NCHW"),
    ) + b.reshape(1, C, 1, 1)

    # f32 compute path.
    out = jax.block_until_ready(downsample(x, w, b))
    assert out.shape == (N, C, H // 2, W // 2), out.shape
    assert jnp.allclose(out, ref, atol=1e-4, rtol=1e-4), float(jnp.max(jnp.abs(out - ref)))

    # bf16 MXU path (valid on v5e/v6e/v7x) — f32 accumulation, looser tolerance.
    out_bf16 = jax.block_until_ready(downsample(x, w, b, compute_dtype=jnp.bfloat16))
    assert jnp.allclose(out_bf16, ref, atol=1e-1, rtol=1e-1), float(
        jnp.max(jnp.abs(out_bf16 - ref)))

    print("KERNEL_OK")
</pallas_src>

<mosaic_0001>
module attributes {stable_mosaic.version = 11 : i64} {
  func.func @_downsample_kernel(%arg0: i32, %arg1: i32, %arg2: i32, %arg3: memref<1x6x4x9x4xf32, #tpu.memory_space<vmem>>, %arg4: memref<36x128xf32, #tpu.memory_space<vmem>>, %arg5: memref<1x128xf32, #tpu.memory_space<vmem>>, %arg6: memref<1x32x128xf32, #tpu.memory_space<vmem>>, %arg7: memref<32x36xf32, #tpu.memory_space<vmem>>) attributes {dimension_semantics = [#tpu.dimension_semantics<parallel>, #tpu.dimension_semantics<parallel>, #tpu.dimension_semantics<parallel>], iteration_bounds = array<i64: 1, 2, 2>, scalar_prefetch = 0 : i64, scratch_operands = 1 : i64, tpu.core_type = #tpu.core_type<tc>, window_params = [{transform_indices = @transform_0, window_bounds = array<i64: 1, 6, 4, 9, 4>}, {transform_indices = @transform_1, window_bounds = array<i64: 36, 128>}, {transform_indices = @transform_2, window_bounds = array<i64: 1, 128>}, {transform_indices = @transform_3, window_bounds = array<i64: 1, 32, 128>}]} {
    %c0 = arith.constant 0 : index
    %c0_0 = arith.constant 0 : index
    %c0_1 = arith.constant 0 : index
    %c0_2 = arith.constant 0 : index
    %c0_3 = arith.constant 0 : index
    %0 = vector.load %arg3[%c0, %c0_0, %c0_1, %c0_2, %c0_3] : memref<1x6x4x9x4xf32, #tpu.memory_space<vmem>>, vector<1x1x4x8x4xf32>
    %1 = vector.shape_cast %0 : vector<1x1x4x8x4xf32> to vector<4x8x4xf32>
    %2 = vector.shape_cast %1 : vector<4x8x4xf32> to vector<32x4xf32>
    %c0_4 = arith.constant 0 : index
    %c0_5 = arith.constant 0 : index
    %3 = vector.load %arg7[%c0_4, %c0_5] : memref<32x36xf32, #tpu.memory_space<vmem>>, vector<32x4xf32>
    tpu.vector_store %arg7[%c0_4, %c0_5], %2 {strides = array<i32>} : memref<32x36xf32, #tpu.memory_space<vmem>>, vector<32x4xf32>,
    %c0_6 = arith.constant 0 : index
    %c1 = arith.constant 1 : index
    %c0_7 = arith.constant 0 : index
    %c0_8 = arith.constant 0 : index
    %c0_9 = arith.constant 0 : index
    %4 = vector.load %arg3[%c0_6, %c1, %c0_7, %c0_8, %c0_9] : memref<1x6x4x9x4xf32, #tpu.memory_space<vmem>>, vector<1x1x4x8x4xf32>
    %5 = vector.shape_cast %4 : vector<1x1x4x8x4xf32> to vector<4x8x4xf32>
    %6 = vector.shape_cast %5 : vector<4x8x4xf32> to vector<32x4xf32>
    %c0_10 = arith.constant 0 : index
    %c4 = arith.constant 4 : index
    %7 = vector.load %arg7[%c0_10, %c4] : memref<32x36xf32, #tpu.memory_space<vmem>>, vector<32x4xf32>
    tpu.vector_store %arg7[%c0_10, %c4], %6 {strides = array<i32>} : memref<32x36xf32, #tpu.memory_space<vmem>>, vector<32x4xf32>,
    %c0_11 = arith.constant 0 : index
    %c0_12 = arith.constant 0 : index
    %c0_13 = arith.constant 0 : index
    %c1_14 = arith.constant 1 : index
    %c0_15 = arith.constant 0 : index
    %8 = vector.load %arg3[%c0_11, %c0_12, %c0_13, %c1_14, %c0_15] : memref<1x6x4x9x4xf32, #tpu.memory_space<vmem>>, vector<1x1x4x8x4xf32>
    %9 = vector.shape_cast %8 : vector<1x1x4x8x4xf32> to vector<4x8x4xf32>
    %10 = vector.shape_cast %9 : vector<4x8x4xf32> to vector<32x4xf32>
    %c0_16 = arith.constant 0 : index
    %c8 = arith.constant 8 : index
    %11 = vector.load %arg7[%c0_16, %c8] : memref<32x36xf32, #tpu.memory_space<vmem>>, vector<32x4xf32>
    tpu.vector_store %arg7[%c0_16, %c8], %10 {strides = array<i32>} : memref<32x36xf32, #tpu.memory_space<vmem>>, vector<32x4xf32>,
    %c0_17 = arith.constant 0 : index
    %c2 = arith.constant 2 : index
    %c0_18 = arith.constant 0 : index
    %c0_19 = arith.constant 0 : index
    %c0_20 = arith.constant 0 : index
    %12 = vector.load %arg3[%c0_17, %c2, %c0_18, %c0_19, %c0_20] : memref<1x6x4x9x4xf32, #tpu.memory_space<vmem>>, vector<1x1x4x8x4xf32>
    %13 = vector.shape_cast %12 : vector<1x1x4x8x4xf32> to vector<4x8x4xf32>
    %14 = vector.shape_cast %13 : vector<4x8x4xf32> to vector<32x4xf32>
    %c0_21 = arith.constant 0 : index
    %c12 = arith.constant 12 : index
    %15 = vector.load %arg7[%c0_21, %c12] : memref<32x36xf32, #tpu.memory_space<vmem>>, vector<32x4xf32>
    tpu.vector_store %arg7[%c0_21, %c12], %14 {strides = array<i32>} : memref<32x36xf32, #tpu.memory_space<vmem>>, vector<32x4xf32>,
    %c0_22 = arith.constant 0 : index
    %c3 = arith.constant 3 : index
    %c0_23 = arith.constant 0 : index
    %c0_24 = arith.constant 0 : index
    %c0_25 = arith.constant 0 : index
    %16 = vector.load %arg3[%c0_22, %c3, %c0_23, %c0_24, %c0_25] : memref<1x6x4x9x4xf32, #tpu.memory_space<vmem>>, vector<1x1x4x8x4xf32>
    %17 = vector.shape_cast %16 : vector<1x1x4x8x4xf32> to vector<4x8x4xf32>
    %18 = vector.shape_cast %17 : vector<4x8x4xf32> to vector<32x4xf32>
    %c0_26 = arith.constant 0 : index
    %c16 = arith.constant 16 : index
    %19 = vector.load %arg7[%c0_26, %c16] : memref<32x36xf32, #tpu.memory_space<vmem>>, vector<32x4xf32>
    tpu.vector_store %arg7[%c0_26, %c16], %18 {strides = array<i32>} : memref<32x36xf32, #tpu.memory_space<vmem>>, vector<32x4xf32>,
    %c0_27 = arith.constant 0 : index
    %c2_28 = arith.constant 2 : index
    %c0_29 = arith.constant 0 : index
    %c1_30 = arith.constant 1 : index
    %c0_31 = arith.constant 0 : index
    %20 = vector.load %arg3[%c0_27, %c2_28, %c0_29, %c1_30, %c0_31] : memref<1x6x4x9x4xf32, #tpu.memory_space<vmem>>, vector<1x1x4x8x4xf32>
    %21 = vector.shape_cast %20 : vector<1x1x4x8x4xf32> to vector<4x8x4xf32>
    %22 = vector.shape_cast %21 : vector<4x8x4xf32> to vector<32x4xf32>
    %c0_32 = arith.constant 0 : index
    %c20 = arith.constant 20 : index
    %23 = vector.load %arg7[%c0_32, %c20] : memref<32x36xf32, #tpu.memory_space<vmem>>, vector<32x4xf32>
    tpu.vector_store %arg7[%c0_32, %c20], %22 {strides = array<i32>} : memref<32x36xf32, #tpu.memory_space<vmem>>, vector<32x4xf32>,
    %c0_33 = arith.constant 0 : index
    %c4_34 = arith.constant 4 : index
    %c0_35 = arith.constant 0 : index
    %c0_36 = arith.constant 0 : index
    %c0_37 = arith.constant 0 : index
    %24 = vector.load %arg3[%c0_33, %c4_34, %c0_35, %c0_36, %c0_37] : memref<1x6x4x9x4xf32, #tpu.memory_space<vmem>>, vector<1x1x4x8x4xf32>
    %25 = vector.shape_cast %24 : vector<1x1x4x8x4xf32> to vector<4x8x4xf32>
    %26 = vector.shape_cast %25 : vector<4x8x4xf32> to vector<32x4xf32>
    %c0_38 = arith.constant 0 : index
    %c24 = arith.constant 24 : index
    %27 = vector.load %arg7[%c0_38, %c24] : memref<32x36xf32, #tpu.memory_space<vmem>>, vector<32x4xf32>
    tpu.vector_store %arg7[%c0_38, %c24], %26 {strides = array<i32>} : memref<32x36xf32, #tpu.memory_space<vmem>>, vector<32x4xf32>,
    %c0_39 = arith.constant 0 : index
    %c5 = arith.constant 5 : index
    %c0_40 = arith.constant 0 : index
    %c0_41 = arith.constant 0 : index
    %c0_42 = arith.constant 0 : index
    %28 = vector.load %arg3[%c0_39, %c5, %c0_40, %c0_41, %c0_42] : memref<1x6x4x9x4xf32, #tpu.memory_space<vmem>>, vector<1x1x4x8x4xf32>
    %29 = vector.shape_cast %28 : vector<1x1x4x8x4xf32> to vector<4x8x4xf32>
    %30 = vector.shape_cast %29 : vector<4x8x4xf32> to vector<32x4xf32>
    %c0_43 = arith.constant 0 : index
    %c28 = arith.constant 28 : index
    %31 = vector.load %arg7[%c0_43, %c28] : memref<32x36xf32, #tpu.memory_space<vmem>>, vector<32x4xf32>
    tpu.vector_store %arg7[%c0_43, %c28], %30 {strides = array<i32>} : memref<32x36xf32, #tpu.memory_space<vmem>>, vector<32x4xf32>,
    %c0_44 = arith.constant 0 : index
    %c4_45 = arith.constant 4 : index
    %c0_46 = arith.constant 0 : index
    %c1_47 = arith.constant 1 : index
    %c0_48 = arith.constant 0 : index
    %32 = vector.load %arg3[%c0_44, %c4_45, %c0_46, %c1_47, %c0_48] : memref<1x6x4x9x4xf32, #tpu.memory_space<vmem>>, vector<1x1x4x8x4xf32>
    %33 = vector.shape_cast %32 : vector<1x1x4x8x4xf32> to vector<4x8x4xf32>
    %34 = vector.shape_cast %33 : vector<4x8x4xf32> to vector<32x4xf32>
    %c0_49 = arith.constant 0 : index
    %c32 = arith.constant 32 : index
    %35 = vector.load %arg7[%c0_49, %c32] : memref<32x36xf32, #tpu.memory_space<vmem>>, vector<32x4xf32>
    tpu.vector_store %arg7[%c0_49, %c32], %34 {strides = array<i32>} : memref<32x36xf32, #tpu.memory_space<vmem>>, vector<32x4xf32>,
    %c0_50 = arith.constant 0 : index
    %c0_51 = arith.constant 0 : index
    %36 = vector.load %arg7[%c0_50, %c0_51] : memref<32x36xf32, #tpu.memory_space<vmem>>, vector<32x36xf32>
    %c0_52 = arith.constant 0 : index
    %c0_53 = arith.constant 0 : index
    %37 = vector.load %arg4[%c0_52, %c0_53] : memref<36x128xf32, #tpu.memory_space<vmem>>, vector<36x128xf32>
    %cst = arith.constant dense<0.000000e+00> : vector<32x128xf32>
    %38 = tpu.matmul %36, %37, %cst {dimension_numbers = #tpu.dot_dimension_numbers<[1], [0], [0], [1], [0, 0, 1, 1], [], []>} : vector<32x36xf32>, vector<36x128xf32>, vector<32x128xf32> -> vector<32x128xf32>
    %c0_54 = arith.constant 0 : index
    %c0_55 = arith.constant 0 : index
    %39 = vector.load %arg5[%c0_54, %c0_55] : memref<1x128xf32, #tpu.memory_space<vmem>>, vector<1x128xf32>
    %40 = vector.broadcast %39 : vector<1x128xf32> to vector<32x128xf32>
    %41 = arith.addf %38, %40 : vector<32x128xf32>
    %c0_56 = arith.constant 0 : index
    %c0_57 = arith.constant 0 : index
    %c0_58 = arith.constant 0 : index
    %42 = vector.load %arg6[%c0_56, %c0_57, %c0_58] : memref<1x32x128xf32, #tpu.memory_space<vmem>>, vector<1x32x128xf32>
    %43 = vector.shape_cast %42 : vector<1x32x128xf32> to vector<32x128xf32>
    %44 = vector.shape_cast %41 : vector<32x128xf32> to vector<1x32x128xf32>
    tpu.vector_store %arg6[%c0_56, %c0_57, %c0_58], %44 {strides = array<i32>} : memref<1x32x128xf32, #tpu.memory_space<vmem>>, vector<1x32x128xf32>,
    return
  }
  func.func @transform_0(%arg0: i32, %arg1: i32, %arg2: i32) -> (i32, i32, i32, i32, i32) {
    %c0_i32 = arith.constant 0 : i32
    %c0_i32_0 = arith.constant 0 : i32
    %c0_i32_1 = arith.constant 0 : i32
    %c0_i32_2 = arith.constant 0 : i32
    return %arg1, %c0_i32, %arg2, %c0_i32_0, %c0_i32_1 : i32, i32, i32, i32, i32
  }
  func.func @transform_1(%arg0: i32, %arg1: i32, %arg2: i32) -> (i32, i32) {
    %c0_i32 = arith.constant 0 : i32
    %c0_i32_0 = arith.constant 0 : i32
    return %c0_i32, %arg0 : i32, i32
  }
  func.func @transform_2(%arg0: i32, %arg1: i32, %arg2: i32) -> (i32, i32) {
    %c0_i32 = arith.constant 0 : i32
    %c0_i32_0 = arith.constant 0 : i32
    return %c0_i32, %arg0 : i32, i32
  }
  func.func @transform_3(%arg0: i32, %arg1: i32, %arg2: i32) -> (i32, i32, i32) {
    %c0_i32 = arith.constant 0 : i32
    return %arg1, %arg2, %arg0 : i32, i32, i32
  }
}

</mosaic_0001>

<bundles_post_ra>
// kernel: tpu_custom_call.1
= control target key start
LH: loop header
LB: loop body
LE: loop exit
PB: predicated region body
PF: predicated region fallthrough
CT: control target
= control target key end

     0   :  { %8 = vsyncpa [#allocation5], 0  ;;  %s1534_s0 = inlined_call_operand.vmem [shape: f32[2,6,8,9,4], index: 0, kind: input, shape index: {}]   ;;  %s1535_s1 = inlined_call_operand.vmem [shape: f32[36,128], index: 1, kind: input, shape index: {}]   ;;  %s1536_s2 = inlined_call_operand.vmem [shape: f32[1,128], index: 2, kind: input, shape index: {}]   ;;  %s1537_s3 = inlined_call_operand.hbm [shape: f32[2,64,128], index: 3, kind: output, shape index: {}]  }
   0x1   :  { %10 = vsyncpa [#allocation5 + $0x1], 0  ;;  %s1222_s12 = smov 0   ;;  %s1224_s13 = smov 0  }
   0x2   :  { %s1226_s14 = smov 0   ;;  %s1228_s15 = smov 0  }
   0x3   :  { %s1230_s16 = smov 0   ;;  %s1232_s17 = smov 0  }
   0x4   :  { %s1234_s18 = smov 0   ;;  %s1236_s19 = smov 0  }
   0x5 LB: > { %s922_s20 = sadd.s32 4294967295, %s1190_s19   ;;  %s923_s21 = sadd.s32 4294967294, %s1190_s19   ;;  %s1190_s19 = sphi %s1236_s19, %s16_s19   ;;  %s1186_s18 = sphi %s1234_s18, %s1547_s18   ;;  %s1182_s17 = sphi %s1232_s17, %s1546_s17   ;;  %s1178_s16 = sphi %s1230_s16, %s1545_s16   ;;  %s1174_s15 = sphi %s1228_s15, %s1544_s15   ;;  %s1170_s14 = sphi %s1226_s14, %s1543_s14   ;;  %s1166_s13 = sphi %s1224_s13, %s1542_s13   ;;  %s1162_s12 = sphi %s1222_s12, %s1541_s12  }
   0x6   : > { %s28_s22 = sadd.s32 1, %s1182_s17  ;;  %s31_s23 = sadd.s32 1, %s1186_s18 }
   0x7   : > { %p29_p0 = scmp.ge.s32.totalorder %s28_s22, 2  ;;  %p51_p1 = scmp.ne.s32.totalorder %s1170_s14, %s1166_s13 }
   0x8   : > { %p52_p2 = scmp.eq.s32.totalorder %s1190_s19, 0  ;;  %p137_p5 = scmp.eq.s32.totalorder %s922_s20, 3 }
   0x9   : > { %s1549_s22 = smov (%p29_p0, %s28_s22), 0  ;;  %s1551_s23 = smov (!%p29_p0, %s31_s23), %s1186_s18 }
   0xa   : > { %s40_s24 = ssub.s32 %s1182_s17, %s1549_s22  ;;  %p1274_p3 = por %p52_p2, %p51_p1 }
   0xb   : > { %p33_p4 = scmp.ge.s32.totalorder %s1551_s23, 2  ;;  %p142_p6 = scmp.ne.s32.totalorder %s1166_s13, %s1162_s12 }
   0xc   : > { %p143_p7 = scmp.eq.s32.totalorder %s923_s21, 3  ;;  %p1282_p8 = por %p137_p5, %p51_p1 }
   0xd   : > { %s1553_s23 = smov (%p33_p4, %s1551_s23), 0  ;;  %s44_s30 = sadd.s32 1, %s1170_s14 }
   0xe   : > { %p1286_p9 = por %p143_p7, %p142_p6  ;;  %s39_s28 = ssub.s32 %s1186_s18, %s1553_s23 }
   0xf   : > { %s41_s29 = sor.u32 %s40_s24, %s39_s28  ;;  %p927_p11 = scmp.ge.s32.totalorder %s1190_s19, 4 }
  0x10   : > { %p42_p10 = scmp.eq.s32.totalorder %s41_s29, 0 }
  0x11   : > { %172 = sbr.rel (%p927_p11) target bundleno = 56 (0x38), region = 24 }
  0x12   : > { %s1294_s4 = scalar_select %p42_p10, %s1170_s14, %s44_s30  }
  0x18   : > { %175 = sbr.rel (!%p1274_p3) target bundleno = 56 (0x38), region = 28  ;;  %s177_s5 = sand.u32 (%p1274_p3), 1, %s1170_s14  }
  0x19   : > { %s1013_s6 = smul.u32 (%p1274_p3), 384, %s177_s5  ;;  %s973_s7 = sshll.u32 (%p1274_p3), %s1182_s17, 3 }
  0x1a   : > { %s1014_s8 = smul.u32 (%p1274_p3), 96, %s1186_s18 }
  0x1b   : > { %s1310_s24 = scalar_lea.vmem (%p1274_p3), [#allocation3], %s1013_s6 }
  0x1c   : > { %s183_s9 = sadd.s32 (%p1274_p3), %s1014_s8, %s973_s7 }
  0x1d   : > { %s930_s10 = sshll.u32 (%p1274_p3), %s183_s9, 3 }
  0x1e   : > { %s1305_s21 = scalar_lea.vmem (%p1274_p3), %s1534_s0, %s930_s10 }
  0x1f   : > { %v307_v0 = vld [vmem:[%s1305_s21] sm:$0xff]  ;;  %v309_v1 = vld [vmem:[%s1305_s21 + $0x8] sm:$0xff]  ;;  %v311_v2 = vld [vmem:[%s1305_s21 + $0x10] sm:$0xff] }
  0x20   : > { %308 = vst [vmem:[%s1310_s24] sm:$0xff] %v307_v0  ;;  %310 = vst [vmem:[%s1310_s24 + $0x8] sm:$0xff] %v309_v1  ;;  %v313_v3 = vld [vmem:[%s1305_s21 + $0x18] sm:$0xff]  ;;  %v315_v4 = vld [vmem:[%s1305_s21 + $0x20] sm:$0xff] }
  0x21   : > { %312 = vst [vmem:[%s1310_s24 + $0x10] sm:$0xff] %v311_v2  ;;  %v317_v5 = vld [vmem:[%s1305_s21 + $0x28] sm:$0xff]  ;;  %314 = vst [vmem:[%s1310_s24 + $0x18] sm:$0xff] %v313_v3  ;;  %v319_v6 = vld [vmem:[%s1305_s21 + $0x30] sm:$0xff] }
  0x22   : > { %316 = vst [vmem:[%s1310_s24 + $0x20] sm:$0xff] %v315_v4  ;;  %318 = vst [vmem:[%s1310_s24 + $0x28] sm:$0xff] %v317_v5  ;;  %v321_v7 = vld [vmem:[%s1305_s21 + $0x38] sm:$0xff]  ;;  %v323_v8 = vld [vmem:[%s1305_s21 + $0x80] sm:$0xff] }
  0x23   : > { %320 = vst [vmem:[%s1310_s24 + $0x30] sm:$0xff] %v319_v6  ;;  %322 = vst [vmem:[%s1310_s24 + $0x38] sm:$0xff] %v321_v7  ;;  %v325_v9 = vld [vmem:[%s1305_s21 + $0x88] sm:$0xff]  ;;  %v327_v10 = vld [vmem:[%s1305_s21 + $0x90] sm:$0xff] }
  0x24   : > { %324 = vst [vmem:[%s1310_s24 + $0x40] sm:$0xff] %v323_v8  ;;  %v329_v11 = vld [vmem:[%s1305_s21 + $0x98] sm:$0xff]  ;;  %326 = vst [vmem:[%s1310_s24 + $0x48] sm:$0xff] %v325_v9  ;;  %v331_v12 = vld [vmem:[%s1305_s21 + $0xa0] sm:$0xff] }
  0x25   : > { %328 = vst [vmem:[%s1310_s24 + $0x50] sm:$0xff] %v327_v10  ;;  %330 = vst [vmem:[%s1310_s24 + $0x58] sm:$0xff] %v329_v11  ;;  %v333_v13 = vld [vmem:[%s1305_s21 + $0xa8] sm:$0xff]  ;;  %v335_v14 = vld [vmem:[%s1305_s21 + $0xb0] sm:$0xff] }
  0x26   : > { %332 = vst [vmem:[%s1310_s24 + $0x60] sm:$0xff] %v331_v12  ;;  %334 = vst [vmem:[%s1310_s24 + $0x68] sm:$0xff] %v333_v13  ;;  %v337_v15 = vld [vmem:[%s1305_s21 + $0xb8] sm:$0xff]  ;;  %v339_v16 = vld [vmem:[%s1305_s21 + $0x100] sm:$0xff] }
  0x27   : > { %336 = vst [vmem:[%s1310_s24 + $0x70] sm:$0xff] %v335_v14  ;;  %v341_v17 = vld [vmem:[%s1305_s21 + $0x108] sm:$0xff]  ;;  %338 = vst [vmem:[%s1310_s24 + $0x78] sm:$0xff] %v337_v15  ;;  %v343_v18 = vld [vmem:[%s1305_s21 + $0x110] sm:$0xff] }
  0x28   : > { %340 = vst [vmem:[%s1310_s24 + $0x80] sm:$0xff] %v339_v16  ;;  %342 = vst [vmem:[%s1310_s24 + $0x88] sm:$0xff] %v341_v17  ;;  %v345_v19 = vld [vmem:[%s1305_s21 + $0x118] sm:$0xff]  ;;  %v347_v20 = vld [vmem:[%s1305_s21 + $0x120] sm:$0xff] }
  0x29   : > { %344 = vst [vmem:[%s1310_s24 + $0x90] sm:$0xff] %v343_v18  ;;  %346 = vst [vmem:[%s1310_s24 + $0x98] sm:$0xff] %v345_v19  ;;  %v349_v21 = vld [vmem:[%s1305_s21 + $0x128] sm:$0xff]  ;;  %v351_v22 = vld [vmem:[%s1305_s21 + $0x130] sm:$0xff] }
  0x2a   : > { %348 = vst [vmem:[%s1310_s24 + $0xa0] sm:$0xff] %v347_v20  ;;  %v353_v23 = vld [vmem:[%s1305_s21 + $0x138] sm:$0xff]  ;;  %350 = vst [vmem:[%s1310_s24 + $0xa8] sm:$0xff] %v349_v21  ;;  %v355_v24 = vld [vmem:[%s1305_s21 + $0x180] sm:$0xff] }
  0x2b   : > { %352 = vst [vmem:[%s1310_s24 + $0xb0] sm:$0xff] %v351_v22  ;;  %354 = vst [vmem:[%s1310_s24 + $0xb8] sm:$0xff] %v353_v23  ;;  %v357_v25 = vld [vmem:[%s1305_s21 + $0x188] sm:$0xff]  ;;  %v359_v26 = vld [vmem:[%s1305_s21 + $0x190] sm:$0xff] }
  0x2c   : > { %356 = vst [vmem:[%s1310_s24 + $0xc0] sm:$0xff] %v355_v24  ;;  %358 = vst [vmem:[%s1310_s24 + $0xc8] sm:$0xff] %v357_v25  ;;  %v361_v27 = vld [vmem:[%s1305_s21 + $0x198] sm:$0xff]  ;;  %v363_v28 = vld [vmem:[%s1305_s21 + $0x1a0] sm:$0xff] }
  0x2d   : > { %360 = vst [vmem:[%s1310_s24 + $0xd0] sm:$0xff] %v359_v26  ;;  %v365_v29 = vld [vmem:[%s1305_s21 + $0x1a8] sm:$0xff]  ;;  %362 = vst [vmem:[%s1310_s24 + $0xd8] sm:$0xff] %v361_v27  ;;  %v367_v30 = vld [vmem:[%s1305_s21 + $0x1b0] sm:$0xff] }
  0x2e   : > { %364 = vst [vmem:[%s1310_s24 + $0xe0] sm:$0xff] %v363_v28  ;;  %366 = vst [vmem:[%s1310_s24 + $0xe8] sm:$0xff] %v365_v29  ;;  %v369_v31 = vld [vmem:[%s1305_s21 + $0x1b8] sm:$0xff]  ;;  %v371_v32 = vld [vmem:[%s1305_s21 + $0x200] sm:$0xff] }
  0x2f   : > { %368 = vst [vmem:[%s1310_s24 + $0xf0] sm:$0xff] %v367_v30  ;;  %370 = vst [vmem:[%s1310_s24 + $0xf8] sm:$0xff] %v369_v31  ;;  %v373_v33 = vld [vmem:[%s1305_s21 + $0x208] sm:$0xff]  ;;  %v375_v34 = vld [vmem:[%s1305_s21 + $0x210] sm:$0xff] }
  0x30   : > { %372 = vst [vmem:[%s1310_s24 + $0x100] sm:$0xff] %v371_v32  ;;  %v377_v35 = vld [vmem:[%s1305_s21 + $0x218] sm:$0xff]  ;;  %374 = vst [vmem:[%s1310_s24 + $0x108] sm:$0xff] %v373_v33  ;;  %v379_v36 = vld [vmem:[%s1305_s21 + $0x220] sm:$0xff] }
  0x31   : > { %376 = vst [vmem:[%s1310_s24 + $0x110] sm:$0xff] %v375_v34  ;;  %378 = vst [vmem:[%s1310_s24 + $0x118] sm:$0xff] %v377_v35  ;;  %v381_v37 = vld [vmem:[%s1305_s21 + $0x228] sm:$0xff]  ;;  %v383_v38 = vld [vmem:[%s1305_s21 + $0x230] sm:$0xff] }
  0x32   : > { %380 = vst [vmem:[%s1310_s24 + $0x120] sm:$0xff] %v379_v36  ;;  %382 = vst [vmem:[%s1310_s24 + $0x128] sm:$0xff] %v381_v37  ;;  %v385_v39 = vld [vmem:[%s1305_s21 + $0x238] sm:$0xff]  ;;  %v387_v40 = vld [vmem:[%s1305_s21 + $0x280] sm:$0xff] }
  0x33   : > { %384 = vst [vmem:[%s1310_s24 + $0x130] sm:$0xff] %v383_v38  ;;  %v389_v41 = vld [vmem:[%s1305_s21 + $0x288] sm:$0xff]  ;;  %386 = vst [vmem:[%s1310_s24 + $0x138] sm:$0xff] %v385_v39  ;;  %v391_v42 = vld [vmem:[%s1305_s21 + $0x290] sm:$0xff] }
  0x34   : > { %388 = vst [vmem:[%s1310_s24 + $0x140] sm:$0xff] %v387_v40  ;;  %390 = vst [vmem:[%s1310_s24 + $0x148] sm:$0xff] %v389_v41  ;;  %v393_v43 = vld [vmem:[%s1305_s21 + $0x298] sm:$0xff]  ;;  %v395_v44 = vld [vmem:[%s1305_s21 + $0x2a0] sm:$0xff] }
  0x35   : > { %392 = vst [vmem:[%s1310_s24 + $0x150] sm:$0xff] %v391_v42  ;;  %394 = vst [vmem:[%s1310_s24 + $0x158] sm:$0xff] %v393_v43  ;;  %v397_v45 = vld [vmem:[%s1305_s21 + $0x2a8] sm:$0xff]  ;;  %v399_v46 = vld [vmem:[%s1305_s21 + $0x2b0] sm:$0xff] }
  0x36   : > { %396 = vst [vmem:[%s1310_s24 + $0x160] sm:$0xff] %v395_v44  ;;  %v401_v47 = vld [vmem:[%s1305_s21 + $0x2b8] sm:$0xff]  ;;  %398 = vst [vmem:[%s1310_s24 + $0x168] sm:$0xff] %v397_v45 }
  0x37   : > { %400 = vst [vmem:[%s1310_s24 + $0x170] sm:$0xff] %v399_v46  ;;  %402 = vst [vmem:[%s1310_s24 + $0x178] sm:$0xff] %v401_v47 }
  0x38 PF: > { %p931_p12 = scmp.ge.s32.totalorder %s1190_s19, 1  ;;  %p407_p13 = scmp.lt.s32.totalorder %s1190_s19, 5 }
  0x3a   : > { %p408_p0 = pnand %p931_p12, %p407_p13 }
  0x3b   : > { %s1408_s25 = sand.u32 (!%p408_p0), 1, %s1166_s13   ;;  %s1192_s30 = smov (!%p408_p0), 4   ;;  %vm457_vm0 = vcmask (!%p408_p0), 31744   ;;  %v671_v12 = vld [vmem:[%s1535_s1] sm:$0xff] (!%p408_p0)  ;;  %v672_v13 = vld [vmem:[%s1535_s1 + $0x8] sm:$0xff] (!%p408_p0)  ;;  %v673_v17 = vld [vmem:[%s1535_s1 + $0x10] sm:$0xff] (!%p408_p0) }
  0x3c   : > { %411 = sbr.rel (%p408_p0) target bundleno = 478 (0x1de), region = 66  ;;  %s1193_s5 = smov (!%p408_p0), 8   ;;  %v999_v14 = vpack.c.bf16 (!%p408_p0), %v672_v13, %v671_v12  ;;  %v674_v18 = vld [vmem:[%s1535_s1 + $0x18] sm:$0xff] (!%p408_p0)  ;;  %v675_v22 = vld [vmem:[%s1535_s1 + $0x20] sm:$0xf] (!%p408_p0)  ;;  %vm696_vm1 = vcmask (!%p408_p0), 1043456  }
  0x3d   : > { %s1015_s28 = smul.u32 (!%p408_p0), 384, %s1408_s25  ;;  %s1194_s6 = smov (!%p408_p0), 12   ;;  %v1003_v19 = vpack.c.bf16 (!%p408_p0), %v674_v18, %v673_v17  ;;  %vm483_vm2 = vcmask (!%p408_p0), 64544   ;;  %vm508_vm3 = vcmask (!%p408_p0), 97344   ;;  %vm534_vm4 = vcmask (!%p408_p0), 130144  }
  0x3e   : > { %s1195_s7 = smov (!%p408_p0), 16   ;;  %s1196_s8 = smov (!%p408_p0), 20   ;;  %1000 = vmatprep.subr.bf16.mxu0 (!%p408_p0), %v999_v14  ;;  %1007 = vmatprep.subr.bf16.mxu1 (!%p408_p0), %v999_v14  ;;  %vm560_vm5 = vcmask (!%p408_p0), 162944   ;;  %vm585_vm6 = vcmask (!%p408_p0), 195744   ;;  %vm611_vm7 = vcmask (!%p408_p0), 228544   ;;  %vm637_vm8 = vcmask (!%p408_p0), 261344  }
  0x3f   : > { %s1411_s29 = scalar_lea.vmem (!%p408_p0), [#allocation3], %s1015_s28  ;;  %s1197_s9 = smov (!%p408_p0), 24   ;;  %1002 = vmatpush3.bf16.msra.mxu0 (!%p408_p0), %v999_v14  ;;  %1010 = vmatpush3.bf16.msra.mxu1 (!%p408_p0), %v999_v14  ;;  %vm662_vm9 = vcmask (!%p408_p0), 294144   ;;  %vm683_vm10 = vcmask (!%p408_p0), 293888  }
  0x40   : > { %v934_v48 = vld [vmem:[%s1411_s29 + $0x50] sm:$0xff] (!%p408_p0)  ;;  %v933_v49 = vld [vmem:[%s1411_s29 + $0x40] sm:$0xff] (!%p408_p0)  ;;  %1004 = vmatprep.subr.bf16.mxu0 (!%p408_p0), %v1003_v19  ;;  %1008 = vmatprep.subr.bf16.mxu1 (!%p408_p0), %v1003_v19  ;;  %s1199_s10 = smov (!%p408_p0), 32   ;;  %s968_s11 = sshll.u32 (!%p408_p0), %s1174_s15, 2 }
  0x41   : > { %473 = vrot.lane.b32.xlu1 (!%p408_p0), %v934_v48, %s1192_s30  ;;  %471 = vrot.lane.b32.xlu0 (!%p408_p0), %v933_v49, %s1192_s30  ;;  %v936_v50 = vld [vmem:[%s1411_s29 + $0x70] sm:$0xff] (!%p408_p0)  ;;  %v935_v51 = vld [vmem:[%s1411_s29 + $0x60] sm:$0xff] (!%p408_p0)  ;;  %s969_s20 = sshll.u32 (!%p408_p0), %s1178_s16, 3 }
  0x42   : > { %v490_v52 = vld [vmem:[%s1411_s29 + $0x21] sm:$0xff] (!%p408_p0)  ;;  %v491_v54 = vld [vmem:[%s1411_s29 + $0x31] sm:$0xff] (!%p408_p0)  ;;  %s803_s21 = sadd.s32 (!%p408_p0), %s969_s20, %s968_s11 }
  0x43   : > { %v488_v53 = vld [vmem:[%s1411_s29 + $0x1] sm:$0xff]  ;;  %v489_v55 = vld [vmem:[%s1411_s29 + $0x11] sm:$0xff]  ;;  %1006 = vmatpush3.bf16.msra.mxu0 %v1003_v19  ;;  %1011 = vmatpush3.bf16.msra.mxu1 %v1003_v19 }
  0x44   : > { %v454_v56 = vld [vmem:[%s1411_s29 + $0x10] sm:$0xff]  ;;  %v453_v57 = vld [vmem:[%s1411_s29] sm:$0xff]  ;;  %991 = vmatprep.subr.msk.mxu0 %vm696_vm1, %v675_v22  ;;  %1009 = vmatprep.subr.msk.mxu1 %vm696_vm1, %v675_v22 }
  0x45   : > { %477 = vrot.lane.b32.xlu1 %v936_v50, %s1192_s30  ;;  %475 = vrot.lane.b32.xlu0 %v935_v51, %s1192_s30  ;;  %459 = vst.msk [vmem:[#allocation2 + $0x8] sm:$0xff] %vm457_vm0, %v454_v56  ;;  %v456_v58 = vld [vmem:[%s1411_s29 + $0x30] sm:$0xff]  ;;  %v455_v59 = vld [vmem:[%s1411_s29 + $0x20] sm:$0xff]  ;;  %458 = vst.msk [vmem:[#allocation2] sm:$0xff] %vm457_vm0, %v453_v57 }
  0x46   : > { %461 = vst.msk [vmem:[#allocation2 + $0x18] sm:$0xff] %vm457_vm0, %v456_v58  ;;  %460 = vst.msk [vmem:[#allocation2 + $0x10] sm:$0xff] %vm457_vm0, %v455_v59  ;;  %v939_v60 = vld [vmem:[%s1411_s29 + $0xa0] sm:$0xff]  ;;  %v940_v62 = vld [vmem:[%s1411_s29 + $0xb0] sm:$0xff] }
  0x47   : > { %v937_v61 = vld [vmem:[%s1411_s29 + $0x80] sm:$0xff]  ;;  %v938_v63 = vld [vmem:[%s1411_s29 + $0x90] sm:$0xff]  ;;  %992 = vmatpush3.msk.msra.mxu0 %vm696_vm1, %v675_v22  ;;  %1012 = vmatpush3.msk.msra.mxu1 %vm696_vm1, %v675_v22 }
  0x48   : > { %v943_v0 = vld [vmem:[%s1411_s29 + $0xe0] sm:$0xff]  ;;  %v944_v2 = vld [vmem:[%s1411_s29 + $0xf0] sm:$0xff] }
  0x49   : > { %500 = vrot.lane.b32.xlu1 %v490_v52, %s1193_s5  ;;  %496 = vrot.lane.b32.xlu0 %v488_v53, %s1193_s5  ;;  %v941_v1 = vld [vmem:[%s1411_s29 + $0xc0] sm:$0xff]  ;;  %v942_v3 = vld [vmem:[%s1411_s29 + $0xd0] sm:$0xff] }
  0x4a   : > { %v947_v4 = vld [vmem:[%s1411_s29 + $0xa1] sm:$0xff]  ;;  %v948_v6 = vld [vmem:[%s1411_s29 + $0xb1] sm:$0xff] }
  0x4b   : > { %v945_v5 = vld [vmem:[%s1411_s29 + $0x81] sm:$0xff]  ;;  %v946_v7 = vld [vmem:[%s1411_s29 + $0x91] sm:$0xff] }
  0x4c   : > { %v951_v8 = vld [vmem:[%s1411_s29 + $0x120] sm:$0xff]  ;;  %v952_v10 = vld [vmem:[%s1411_s29 + $0x130] sm:$0xff] }
  0x4d   : > { %502 = vrot.lane.b32.xlu1 %v491_v54, %s1193_s5  ;;  %498 = vrot.lane.b32.xlu0 %v489_v55, %s1193_s5  ;;  %v949_v9 = vld [vmem:[%s1411_s29 + $0x100] sm:$0xff]  ;;  %v950_v11 = vld [vmem:[%s1411_s29 + $0x110] sm:$0xff] }
  0x4e   : > { %v955_v15 = vld [vmem:[%s1411_s29 + $0x160] sm:$0xff]  ;;  %v956_v20 = vld [vmem:[%s1411_s29 + $0x170] sm:$0xff] }
  0x4f   : > { %v953_v16 = vld [vmem:[%s1411_s29 + $0x140] sm:$0xff]  ;;  %v954_v21 = vld [vmem:[%s1411_s29 + $0x150] sm:$0xff] }
  0x50   : > { %v959_v23 = vld [vmem:[%s1411_s29 + $0x121] sm:$0xff]  ;;  %v960_v25 = vld [vmem:[%s1411_s29 + $0x131] sm:$0xff] }
  0x51   : > { %526 = vrot.lane.b32.xlu1 %v939_v60, %s1194_s6  ;;  %522 = vrot.lane.b32.xlu0 %v937_v61, %s1194_s6  ;;  %v957_v24 = vld [vmem:[%s1411_s29 + $0x101] sm:$0xff]  ;;  %v958_v26 = vld [vmem:[%s1411_s29 + $0x111] sm:$0xff]  ;;  %s932_s29 = sshll.u32 %s1408_s25, 5 }
  0x52   : > { %s443_s30 = scalar_lea.vmem [#allocation4], %s932_s29  ;;  %s1200_s29 = smov [#allocation4]  }
  0x53   : > { %s1100_s11 = sshll.u32 %s1200_s29, 4  ;;  %s1101_s11 = int_to_ptr.vmem [resolvable:$false] %s1100_s11 }
  0x54   : > { %s1102_s20 = scalar_lea.vmem %s1101_s11, 1024 }
  0x55   : > { %528 = vrot.lane.b32.xlu1 %v940_v62, %s1194_s6  ;;  %524 = vrot.lane.b32.xlu0 %v938_v63, %s1194_s6  ;;  %v961_v63 = vld [vmem:[%s1536_s2] ss:$0 sm:$0xff]  ;;  %s806_s6 = sshll.u32 %s443_s30, 4  ;;  %s1474_s6 = int_to_ptr.vmem [resolvable:$true] %s806_s6 }
  0x56   : > { %p1103_p4 = scmp.lt.s32.totalorder %s1474_s6, %s1101_s11 }
  0x59   : > { %552 = vrot.lane.b32.xlu1 %v943_v0, %s1195_s7  ;;  %548 = vrot.lane.b32.xlu0 %v941_v1, %s1195_s7 }
  0x5d   : > { %554 = vrot.lane.b32.xlu1 %v944_v2, %s1195_s7  ;;  %550 = vrot.lane.b32.xlu0 %v942_v3, %s1195_s7  ;;  %s1198_s7 = smov 28  }
  0x61   : > { %577 = vrot.lane.b32.xlu1 %v947_v4, %s1196_s8  ;;  %573 = vrot.lane.b32.xlu0 %v945_v5, %s1196_s8 }
  0x65   : > { %579 = vrot.lane.b32.xlu1 %v948_v6, %s1196_s8  ;;  %575 = vrot.lane.b32.xlu0 %v946_v7, %s1196_s8 }
  0x69   : > { %603 = vrot.lane.b32.xlu1 %v951_v8, %s1197_s9  ;;  %599 = vrot.lane.b32.xlu0 %v949_v9, %s1197_s9 }
  0x6d   : > { %605 = vrot.lane.b32.xlu1 %v952_v10, %s1197_s9  ;;  %601 = vrot.lane.b32.xlu0 %v950_v11, %s1197_s9  ;;  %s790_s9 = scalar_lea.sflag [#allocation5], %s1408_s25 }
  0x71   : > { %629 = vrot.lane.b32.xlu1 %v955_v15, %s1198_s7  ;;  %625 = vrot.lane.b32.xlu0 %v953_v16, %s1198_s7 }
  0x75   : > { %631 = vrot.lane.b32.xlu1 %v956_v20, %s1198_s7  ;;  %627 = vrot.lane.b32.xlu0 %v954_v21, %s1198_s7  ;;  %s970_s7 = sshll.u32 %s803_s21, 7 }
  0x76   : > { %s1479_s8 = scalar_lea.hbm %s1537_s3, %s970_s7 }
  0x79   : > { %654 = vrot.lane.b32.xlu1 %v959_v23, %s1199_s10  ;;  %650 = vrot.lane.b32.xlu0 %v957_v24, %s1199_s10 }
  0x7d   : > { %656 = vrot.lane.b32.xlu1 %v960_v25, %s1199_s10  ;;  %652 = vrot.lane.b32.xlu0 %v958_v26, %s1199_s10  ;;  %s1096_s10 = scalar_lea.vmem %s1474_s6, 512 }
  0x7e   : > { %p1097_p1 = scmp.ne.s32.totalorder %s1474_s6, %s1096_s10  ;;  %p1104_p5 = scmp.lt.s32.totalorder %s1102_s20, %s1096_s10 }
  0x80   : > { %p1098_p2 = pnand %p1097_p1, %p1282_p8  ;;  %p1105_p6 = por %p1104_p5, %p1103_p4 }
  0x82   : > { %p1099_p3 = pneg %p1098_p2 }
  0x84   : > { %p1106_p7 = pnand %p1105_p6, %p1099_p3 }
  0xb3   : > { %v474_v27 = vpop.permute.xlu1 %473  ;;  %v472_v28 = vpop.permute.xlu0 %471 }
  0xb4   : > { %485 = vst.msk [vmem:[#allocation2 + $0x8] sm:$0xff] %vm483_vm2, %v474_v27  ;;  %484 = vst.msk [vmem:[#allocation2] sm:$0xff] %vm483_vm2, %v472_v28 }
  0xb7   : > { %v478_v29 = vpop.permute.xlu1 %477  ;;  %v476_v30 = vpop.permute.xlu0 %475 }
  0xb8   : > { %487 = vst.msk [vmem:[#allocation2 + $0x18] sm:$0xff] %vm483_vm2, %v478_v29  ;;  %486 = vst.msk [vmem:[#allocation2 + $0x10] sm:$0xff] %vm483_vm2, %v476_v30 }
  0xbb   : > { %v501_v31 = vpop.permute.xlu1 %500  ;;  %v497_v32 = vpop.permute.xlu0 %496 }
  0xbc   : > { %511 = vst.msk [vmem:[#allocation2 + $0x10] sm:$0xff] %vm508_vm3, %v501_v31  ;;  %509 = vst.msk [vmem:[#allocation2] sm:$0xff] %vm508_vm3, %v497_v32 }
  0xbf   : > { %v503_v33 = vpop.permute.xlu1 %502  ;;  %v499_v34 = vpop.permute.xlu0 %498 }
  0xc0   : > { %512 = vst.msk [vmem:[#allocation2 + $0x18] sm:$0xff] %vm508_vm3, %v503_v33  ;;  %510 = vst.msk [vmem:[#allocation2 + $0x8] sm:$0xff] %vm508_vm3, %v499_v34 }
  0xc3   : > { %v527_v35 = vpop.permute.xlu1 %526  ;;  %v523_v36 = vpop.permute.xlu0 %522 }
  0xc4   : > { %537 = vst.msk [vmem:[#allocation2 + $0x10] sm:$0xff] %vm534_vm4, %v527_v35  ;;  %535 = vst.msk [vmem:[#allocation2] sm:$0xff] %vm534_vm4, %v523_v36 }
  0xc7   : > { %v529_v37 = vpop.permute.xlu1 %528  ;;  %v525_v38 = vpop.permute.xlu0 %524 }
  0xc8   : > { %538 = vst.msk [vmem:[#allocation2 + $0x18] sm:$0xff] %vm534_vm4, %v529_v37  ;;  %536 = vst.msk [vmem:[#allocation2 + $0x8] sm:$0xff] %vm534_vm4, %v525_v38 }
  0xcb   : > { %v553_v39 = vpop.permute.xlu1 %552  ;;  %v549_v40 = vpop.permute.xlu0 %548 }
  0xcc   : > { %563 = vst.msk [vmem:[#allocation2 + $0x10] sm:$0xff] %vm560_vm5, %v553_v39  ;;  %561 = vst.msk [vmem:[#allocation2] sm:$0xff] %vm560_vm5, %v549_v40 }
  0xcf   : > { %v555_v41 = vpop.permute.xlu1 %554  ;;  %v551_v42 = vpop.permute.xlu0 %550 }
  0xd0   : > { %564 = vst.msk [vmem:[#allocation2 + $0x18] sm:$0xff] %vm560_vm5, %v555_v41  ;;  %562 = vst.msk [vmem:[#allocation2 + $0x8] sm:$0xff] %vm560_vm5, %v551_v42 }
  0xd3   : > { %v578_v43 = vpop.permute.xlu1 %577  ;;  %v574_v44 = vpop.permute.xlu0 %573 }
  0xd4   : > { %588 = vst.msk [vmem:[#allocation2 + $0x10] sm:$0xff] %vm585_vm6, %v578_v43  ;;  %586 = vst.msk [vmem:[#allocation2] sm:$0xff] %vm585_vm6, %v574_v44 }
  0xd7   : > { %v580_v45 = vpop.permute.xlu1 %579  ;;  %v576_v46 = vpop.permute.xlu0 %575 }
  0xd8   : > { %589 = vst.msk [vmem:[#allocation2 + $0x18] sm:$0xff] %vm585_vm6, %v580_v45  ;;  %587 = vst.msk [vmem:[#allocation2 + $0x8] sm:$0xff] %vm585_vm6, %v576_v46 }
  0xdb   : > { %v604_v47 = vpop.permute.xlu1 %603  ;;  %v600_v48 = vpop.permute.xlu0 %599 }
  0xdc   : > { %614 = vst.msk [vmem:[#allocation2 + $0x10] sm:$0xff] %vm611_vm7, %v604_v47  ;;  %612 = vst.msk [vmem:[#allocation2] sm:$0xff] %vm611_vm7, %v600_v48 }
  0xdf   : > { %v606_v49 = vpop.permute.xlu1 %605  ;;  %v602_v50 = vpop.permute.xlu0 %601 }
  0xe0   : > { %615 = vst.msk [vmem:[#allocation2 + $0x18] sm:$0xff] %vm611_vm7, %v606_v49  ;;  %613 = vst.msk [vmem:[#allocation2 + $0x8] sm:$0xff] %vm611_vm7, %v602_v50 }
  0xe3   : > { %v630_v51 = vpop.permute.xlu1 %629  ;;  %v626_v52 = vpop.permute.xlu0 %625 }
  0xe4   : > { %640 = vst.msk [vmem:[#allocation2 + $0x10] sm:$0xff] %vm637_vm8, %v630_v51  ;;  %638 = vst.msk [vmem:[#allocation2] sm:$0xff] %vm637_vm8, %v626_v52 }
  0xe7   : > { %v632_v53 = vpop.permute.xlu1 %631  ;;  %v628_v54 = vpop.permute.xlu0 %627 }
  0xe8   : > { %641 = vst.msk [vmem:[#allocation2 + $0x18] sm:$0xff] %vm637_vm8, %v632_v53  ;;  %639 = vst.msk [vmem:[#allocation2 + $0x8] sm:$0xff] %vm637_vm8, %v628_v54 }
  0xeb   : > { %v655_v55 = vpop.permute.xlu1 %654  ;;  %v651_v56 = vpop.permute.xlu0 %650 }
  0xec   : > { %665 = vst.msk [vmem:[#allocation2 + $0x10] sm:$0xff] %vm662_vm9, %v655_v55  ;;  %663 = vst.msk [vmem:[#allocation2] sm:$0xff] %vm662_vm9, %v651_v56 }
  0xef   : > { %v657_v57 = vpop.permute.xlu1 %656  ;;  %v653_v58 = vpop.permute.xlu0 %652 }
  0xf0   : > { %666 = vst.msk [vmem:[#allocation2 + $0x18] sm:$0xff] %vm662_vm9, %v657_v57  ;;  %664 = vst.msk [vmem:[#allocation2 + $0x8] sm:$0xff] %vm662_vm9, %v653_v58 }
  0xf3   : > { %v667_v59 = vld [vmem:[#allocation2] sm:$0xff]  ;;  %v669_v60 = vld [vmem:[#allocation2 + $0x10] sm:$0xff] }
  0xf4   : > { %993 = vmatprep.mubr.msk.f32.mxu0 %vm683_vm10, %v667_v59  ;;  %996 = vmatprep.mubr.msk.f32.mxu1 %vm683_vm10, %v669_v60 }
  0xf7   : > { %v668_v61 = vld [vmem:[#allocation2 + $0x8] sm:$0xff]  ;;  %v670_v62 = vld [vmem:[#allocation2 + $0x18] sm:$0xff] }
  0xf8   : > { %994 = vmatmul.mubr.msk.f32.vlgmr.msra.gmra.mrb[0].mxu0 %vm683_vm10, %v668_v61  ;;  %997 = vmatmul.mubr.msk.f32.vlgmr.msra.gmra.mrb[0].mxu1 %vm683_vm10, %v670_v62 }
 0x1cb   : > { %v995_v0 = vpop.f32.mrb[0].mxu0  ;;  %v998_v1 = vpop.f32.mrb[0].mxu1 }
 0x1cc   : > { %v772_v2 = vadd.f32 %v995_v0, %v961_v63  ;;  %v782_v3 = vadd.f32 %v998_v1, %v961_v63  ;;  %v766_v4 = vpop.f32.mrb[1].mxu0  ;;  %v776_v5 = vpop.f32.mrb[1].mxu1 }
 0x1cd   : > { %v767_v6 = vadd.f32 %v961_v63, %v766_v4  ;;  %v777_v7 = vadd.f32 %v961_v63, %v776_v5 }
 0x1ce   : > { %786 = vst [vmem:[%s443_s30 + $0x8] sm:$0xff] %v772_v2  ;;  %788 = vst [vmem:[%s443_s30 + $0x18] sm:$0xff] %v782_v3 }
 0x1cf   : > { %785 = vst [vmem:[%s443_s30] sm:$0xff] %v767_v6  ;;  %787 = vst [vmem:[%s443_s30 + $0x10] sm:$0xff] %v777_v7 }
 0x1d0   : > { %1109 = shalt.err (!%p1106_p7)
}
 0x1d1   : > { %s1110_s21 = scalar_lea.hbm %s1479_s8, 512  ;;  %s1114_s30 = scalar_lea.hbm %s1537_s3, 2048 }
 0x1d2   : > { %p1111_p10 = scmp.ne.s32.totalorder %s1479_s8, %s1110_s21  ;;  %p1115_p13 = scmp.lt.u32.totalorder %s1479_s8, %s1537_s3 }
 0x1d3   : > { %p1116_p0 = scmp.lt.u32.totalorder %s1114_s30, %s1110_s21  ;;  %p1118_p2 = scmp.lt.u32.totalorder %s1110_s21, %s1479_s8 }
 0x1d4   : > { %p1112_p11 = pnand %p1111_p10, %p1282_p8 }
 0x1d5   : > { %p1117_p1 = por %p1116_p0, %p1115_p13 }
 0x1d6   : > { %p1113_p12 = pneg %p1112_p11 }
 0x1d7   : > { %p1119_p3 = por %p1118_p2, %p1117_p1 }
 0x1d9   : > { %p1120_p4 = pnand %p1119_p3, %p1113_p12 }
 0x1db   : > { %1123 = shalt.err (!%p1120_p4)
}
 0x1dc   : > { %s1201_s16 = smov 128  }
 0x1dd   : > { %1016 = dma.vmem_to_hbm [thread:$0]  (%p1282_p8), %s1474_s6, 512, %s1479_s8, %s790_s9, %s1201_s16, %s1201_s16, %s1193_s5  }
 0x1de PF: > { %p1022_p5 = scmp.ge.s32.totalorder %s1190_s19, 2  ;;  %s821_s10 = sand.u32 1, %s1162_s12  }
 0x1df   : > { %s822_s29 = scalar_lea.sflag [#allocation5], %s821_s10 }
 0x1e0   : > { %p1019_p6 = pnand %p1022_p5, %p1286_p9 }
 0x1e2   : > { %1157 = dma.done.wait (!%p1019_p6), %s822_s29, 512  }
 0x1e3   : > { %1159 = vsyncadd (!%p1019_p6), %s822_s29, 4294966784  ;;  %s16_s19 = sadd.s32 1, %s1190_s19   ;;  %s1541_s12 = smov %s1166_s13 }
 0x1e4   : > { %p13_p7 = scmp.ge.s32.totalorder %s16_s19, 6   ;;  %s1542_s13 = smov %s1170_s14 }
 0x1e5   : > { %s1543_s14 = smov %s1294_s4  ;;  %s1544_s15 = smov %s1182_s17 }
 0x1e6   : > { %s1545_s16 = smov %s1186_s18  ;;  %s1546_s17 = smov %s1549_s22 }
 0x1e7   : > { %s1547_s18 = smov %s1553_s23  ;;  %15 = sbr.rel (!%p13_p7) target bundleno = 5 (0x5), region = 121 }
 0x1ee   :  { %827 = vsyncpa [#allocation5], 1 }
 0x1ef   :  { %829 = vsyncpa [#allocation5 + $0x1], 1 }

</bundles_post_ra>
